<compile_context>
chip_gen: v7x
topology: tpu7x:2x2x1
jax: 0.10.0
libtpu: 0.0.40
codegen_flags: <defaults>
</compile_context>

<pallas_src>
import jax
import jax.numpy as jnp
from jax.experimental import pallas as pl
from jax.experimental.pallas import tpu as pltpu

LANE = 128
LEAKY_SLOPE = 0.01


def backbone_kernel(x_ref, src_oh_ref, tgt_oh_t_ref, ea_ref,
                    we_ref, be_ref, w_ref, b_ref, out_ref):
    """Whole GINEConv + LeakyReLU stack in one invocation (no grid)."""
    h = x_ref[...]                                            # (N, F) f32, resident
    src_oh = src_oh_ref[...].astype(jnp.float32)              # (E, N) gather matrix
    tgt_oh_t = tgt_oh_t_ref[...].astype(jnp.float32)          # (N, E) scatter matrix
    ea = ea_ref[...]                                          # (E, 2)
    ea0 = ea[:, 0:1]                                          # (E, 1)
    ea1 = ea[:, 1:2]                                          # (E, 1)

    n_layers = we_ref.shape[0]                                # static -> loop unrolls
    for l in range(n_layers):
        we_l = we_ref[l]                                      # (2, F)
        be_l = be_ref[l]                                      # (1, F)
        w_l = w_ref[l]                                        # (F, F)
        b_l = b_ref[l]                                        # (1, F)

        # Edge-feature projection Linear(2 -> F) on the VPU: a K=2 contraction is not
        # worth an MXU pass -- two broadcast FMAs instead.
        e_proj = ea0 * we_l[0:1, :] + ea1 * we_l[1:2, :] + be_l          # (E, F)

        # Gather source-node features via one-hot matmul: (E, N) @ (N, F).
        x_src = jnp.dot(src_oh, h, preferred_element_type=jnp.float32)   # (E, F)

        # GINE message: ReLU(x_j + e).
        msg = jnp.maximum(x_src + e_proj, 0.0)                           # (E, F)

        # Scatter-sum to target nodes: (N, E) @ (E, F), f32 accumulation.
        aggr = jnp.dot(tgt_oh_t, msg, preferred_element_type=jnp.float32)  # (N, F)

        # Node update: nn((1 + eps) * x + aggr) with eps = 0, then LeakyReLU(0.01).
        upd = jnp.dot(h + aggr, w_l, preferred_element_type=jnp.float32) + b_l
        h = jnp.maximum(upd, LEAKY_SLOPE * upd)                          # LeakyReLU

    # Only the final layer's features leave VMEM.
    out_ref[...] = h


def _round_up(v, m):
    return (v + m - 1) // m * m


def pack_params(params, feat_pad):
    """Zero-pad every layer's weights to a common lane-dense feature width and stack."""
    we_l, be_l, w_l, b_l = [], [], [], []
    for (w_e, b_e, w, b) in params:
        din, hid = w.shape
        we_l.append(jnp.pad(w_e, ((0, 0), (0, feat_pad - din))))
        be_l.append(jnp.pad(b_e, (0, feat_pad - din)).reshape(1, feat_pad))
        w_l.append(jnp.pad(w, ((0, feat_pad - din), (0, feat_pad - hid))))
        b_l.append(jnp.pad(b, (0, feat_pad - hid)).reshape(1, feat_pad))
    return (jnp.stack(we_l), jnp.stack(be_l), jnp.stack(w_l), jnp.stack(b_l))


def backbone_forward(params, x, edge_index, edge_attr):
    n_nodes, input_dim = x.shape
    hidden_dim = params[0][2].shape[1]
    n_layers = len(params)
    n_edges = edge_index.shape[1]
    feat = _round_up(max(input_dim, hidden_dim), LANE)   # lane-dense feature width

    # Layer-invariant graph tensors (built once, DMA'd into VMEM once).
    x_pad = jnp.pad(x.astype(jnp.float32), ((0, 0), (0, feat - input_dim)))
    # 0/1 one-hot values are exact in bf16 -> half the O(N*E) HBM/VMEM/DMA bytes.
    src_oh = jax.nn.one_hot(edge_index[0], n_nodes, dtype=jnp.bfloat16)      # (E, N)
    tgt_oh_t = jax.nn.one_hot(edge_index[1], n_nodes, dtype=jnp.bfloat16).T  # (N, E)
    ea = edge_attr.astype(jnp.float32)                                       # (E, 2)

    we_all, be_all, w_all, b_all = pack_params(params, feat)

    flops = 2 * n_layers * (
        n_edges * 2 * feat            # edge linear (VPU)
        + n_edges * n_nodes * feat    # gather
        + n_nodes * n_edges * feat    # scatter-sum
        + n_nodes * feat * feat)      # node linear
    operands = (x_pad, src_oh, tgt_oh_t, ea, we_all, be_all, w_all, b_all)
    bytes_accessed = sum(int(a.size) * a.dtype.itemsize for a in operands) \
        + n_nodes * feat * 4

    vmem = pl.BlockSpec(memory_space=pltpu.MemorySpace.VMEM)   # whole array, VMEM-resident

    out = pl.pallas_call(
        backbone_kernel,
        out_shape=jax.ShapeDtypeStruct((n_nodes, feat), jnp.float32),
        in_specs=[vmem] * len(operands),
        out_specs=vmem,
        cost_estimate=pl.CostEstimate(flops=flops, transcendentals=0,
                                      bytes_accessed=bytes_accessed),
    )(*operands)

    return out[:, :hidden_dim]


def init_params(key, input_dim, hidden_dim, n_layers):
    """Deterministic synthetic parameters (shapes match the torch module)."""
    params = []
    for i in range(n_layers):
        din = input_dim if i == 0 else hidden_dim
        key, k1, k2, k3, k4 = jax.random.split(key, 5)
        w_e = jax.random.normal(k1, (2, din), jnp.float32) / jnp.sqrt(2.0)
        b_e = 0.01 * jax.random.normal(k2, (din,), jnp.float32)
        w = jax.random.normal(k3, (din, hidden_dim), jnp.float32) / jnp.sqrt(float(din))
        b = 0.01 * jax.random.normal(k4, (hidden_dim,), jnp.float32)
        params.append((w_e, b_e, w, b))
    return params


def backbone_reference(params, x, edge_index, edge_attr):
    """Pure-JAX reference of the GINEConv + LeakyReLU stack (for validation)."""
    n_nodes = x.shape[0]
    src, tgt = edge_index[0], edge_index[1]
    h = x
    for (w_e, b_e, w, b) in params:
        e = edge_attr @ w_e + b_e
        msg = jnp.maximum(h[src] + e, 0.0)
        aggr = jax.ops.segment_sum(msg, tgt, num_segments=n_nodes)
        out = (h + aggr) @ w + b
        h = jnp.where(out > 0, out, 0.01 * out)
    return h


if __name__ == "__main__":
    INPUT_DIM = 4
    HIDDEN_DIM = 128   # module default hidden_dim (lane-dense)
    N_LAYERS = 3
    N_NODES = 16
    N_EDGES = 32

    key = jax.random.PRNGKey(0)
    key, kx, ke_idx, ke_attr, kp = jax.random.split(key, 5)

    x = jax.random.normal(kx, (N_NODES, INPUT_DIM), jnp.float32)
    edge_index = jax.random.randint(ke_idx, (2, N_EDGES), 0, N_NODES, jnp.int32)
    edge_attr = jax.random.normal(ke_attr, (N_EDGES, 2), jnp.float32)

    params = init_params(kp, INPUT_DIM, HIDDEN_DIM, N_LAYERS)

    out = backbone_forward(params, x, edge_index, edge_attr)
    out = jax.block_until_ready(out)

    ref = backbone_reference(params, x, edge_index, edge_attr)
    assert out.shape == (N_NODES, HIDDEN_DIM)

    # Scale-aware check.  Kernel and reference are both f32 with f32 accumulation, so
    # agreement is ~1e-6; the 2e-2 margin only covers XLA's default f32 matmul
    # precision on TPU (bf16 passes) potentially differing from Mosaic's MXU f32 path.
    # A semantic bug (wrong gather/scatter/residual) shows up as O(1) error.
    denom = jnp.maximum(jnp.max(jnp.abs(ref)), 1.0)
    max_err = float(jnp.max(jnp.abs(out - ref)) / denom)
    assert max_err < 2e-2, \
        f"Pallas kernel mismatch vs reference (normalized max err {max_err})"

    print("KERNEL_OK")
</pallas_src>

<mosaic_0001>
module attributes {stable_mosaic.version = 11 : i64} {
  func.func @backbone_kernel(%arg0: memref<16x128xf32, #tpu.memory_space<vmem>>, %arg1: memref<32x16xbf16, #tpu.memory_space<vmem>>, %arg2: memref<16x32xbf16, #tpu.memory_space<vmem>>, %arg3: memref<32x2xf32, #tpu.memory_space<vmem>>, %arg4: memref<3x2x128xf32, #tpu.memory_space<vmem>>, %arg5: memref<3x1x128xf32, #tpu.memory_space<vmem>>, %arg6: memref<3x128x128xf32, #tpu.memory_space<vmem>>, %arg7: memref<3x1x128xf32, #tpu.memory_space<vmem>>, %arg8: memref<16x128xf32, #tpu.memory_space<vmem>>) attributes {dimension_semantics = [], scalar_prefetch = 0 : i64, scratch_operands = 0 : i64, tpu.core_type = #tpu.core_type<tc>} {
    %c0 = arith.constant 0 : index
    %c0_0 = arith.constant 0 : index
    %0 = vector.load %arg0[%c0, %c0_0] : memref<16x128xf32, #tpu.memory_space<vmem>>, vector<16x128xf32>
    %c0_1 = arith.constant 0 : index
    %c0_2 = arith.constant 0 : index
    %1 = vector.load %arg1[%c0_1, %c0_2] : memref<32x16xbf16, #tpu.memory_space<vmem>>, vector<32x16xbf16>
    %2 = arith.extf %1 : vector<32x16xbf16> to vector<32x16xf32>
    %c0_3 = arith.constant 0 : index
    %c0_4 = arith.constant 0 : index
    %3 = vector.load %arg2[%c0_3, %c0_4] : memref<16x32xbf16, #tpu.memory_space<vmem>>, vector<16x32xbf16>
    %4 = arith.extf %3 : vector<16x32xbf16> to vector<16x32xf32>
    %c0_5 = arith.constant 0 : index
    %c0_6 = arith.constant 0 : index
    %5 = vector.load %arg3[%c0_5, %c0_6] : memref<32x2xf32, #tpu.memory_space<vmem>>, vector<32x2xf32>
    %6 = vector.extract_strided_slice %5 {offsets = [0, 0], sizes = [32, 1], strides = [1, 1]} : vector<32x2xf32> to vector<32x1xf32>
    %7 = vector.extract_strided_slice %5 {offsets = [0, 1], sizes = [32, 1], strides = [1, 1]} : vector<32x2xf32> to vector<32x1xf32>
    %c0_7 = arith.constant 0 : index
    %c0_8 = arith.constant 0 : index
    %c0_9 = arith.constant 0 : index
    %8 = vector.load %arg4[%c0_7, %c0_8, %c0_9] : memref<3x2x128xf32, #tpu.memory_space<vmem>>, vector<1x2x128xf32>
    %9 = vector.shape_cast %8 : vector<1x2x128xf32> to vector<2x128xf32>
    %c0_10 = arith.constant 0 : index
    %c0_11 = arith.constant 0 : index
    %c0_12 = arith.constant 0 : index
    %10 = vector.load %arg5[%c0_10, %c0_11, %c0_12] : memref<3x1x128xf32, #tpu.memory_space<vmem>>, vector<1x1x128xf32>
    %11 = vector.shape_cast %10 : vector<1x1x128xf32> to vector<1x128xf32>
    %c0_13 = arith.constant 0 : index
    %c0_14 = arith.constant 0 : index
    %c0_15 = arith.constant 0 : index
    %12 = vector.load %arg6[%c0_13, %c0_14, %c0_15] : memref<3x128x128xf32, #tpu.memory_space<vmem>>, vector<1x128x128xf32>
    %13 = vector.shape_cast %12 : vector<1x128x128xf32> to vector<128x128xf32>
    %c0_16 = arith.constant 0 : index
    %c0_17 = arith.constant 0 : index
    %c0_18 = arith.constant 0 : index
    %14 = vector.load %arg7[%c0_16, %c0_17, %c0_18] : memref<3x1x128xf32, #tpu.memory_space<vmem>>, vector<1x1x128xf32>
    %15 = vector.shape_cast %14 : vector<1x1x128xf32> to vector<1x128xf32>
    %16 = vector.extract_strided_slice %9 {offsets = [0, 0], sizes = [1, 128], strides = [1, 1]} : vector<2x128xf32> to vector<1x128xf32>
    %17 = vector.broadcast %6 : vector<32x1xf32> to vector<32x128xf32>
    %18 = vector.broadcast %16 : vector<1x128xf32> to vector<32x128xf32>
    %19 = arith.mulf %17, %18 : vector<32x128xf32>
    %20 = vector.extract_strided_slice %9 {offsets = [1, 0], sizes = [1, 128], strides = [1, 1]} : vector<2x128xf32> to vector<1x128xf32>
    %21 = vector.broadcast %7 : vector<32x1xf32> to vector<32x128xf32>
    %22 = vector.broadcast %20 : vector<1x128xf32> to vector<32x128xf32>
    %23 = arith.mulf %21, %22 : vector<32x128xf32>
    %24 = arith.addf %19, %23 : vector<32x128xf32>
    %25 = vector.broadcast %11 : vector<1x128xf32> to vector<32x128xf32>
    %26 = arith.addf %24, %25 : vector<32x128xf32>
    %cst = arith.constant dense<0.000000e+00> : vector<32x128xf32>
    %27 = tpu.matmul %2, %0, %cst {dimension_numbers = #tpu.dot_dimension_numbers<[1], [0], [0], [1], [0, 0, 1, 1], [], []>} : vector<32x16xf32>, vector<16x128xf32>, vector<32x128xf32> -> vector<32x128xf32>
    %28 = arith.addf %27, %26 : vector<32x128xf32>
    %cst_19 = arith.constant 0.000000e+00 : f32
    %29 = vector.broadcast %cst_19 : f32 to vector<32x128xf32>
    %30 = arith.maximumf %28, %29 : vector<32x128xf32>
    %cst_20 = arith.constant dense<0.000000e+00> : vector<16x128xf32>
    %31 = tpu.matmul %4, %30, %cst_20 {dimension_numbers = #tpu.dot_dimension_numbers<[1], [0], [0], [1], [0, 0, 1, 1], [], []>} : vector<16x32xf32>, vector<32x128xf32>, vector<16x128xf32> -> vector<16x128xf32>
    %32 = arith.addf %0, %31 : vector<16x128xf32>
    %cst_21 = arith.constant dense<0.000000e+00> : vector<16x128xf32>
    %33 = tpu.matmul %32, %13, %cst_21 {dimension_numbers = #tpu.dot_dimension_numbers<[1], [0], [0], [1], [0, 0, 1, 1], [], []>} : vector<16x128xf32>, vector<128x128xf32>, vector<16x128xf32> -> vector<16x128xf32>
    %34 = vector.broadcast %15 : vector<1x128xf32> to vector<16x128xf32>
    %35 = arith.addf %33, %34 : vector<16x128xf32>
    %cst_22 = arith.constant 0.00999999977 : f32
    %36 = vector.broadcast %cst_22 : f32 to vector<16x128xf32>
    %37 = arith.mulf %36, %35 : vector<16x128xf32>
    %38 = arith.maximumf %35, %37 : vector<16x128xf32>
    %c1 = arith.constant 1 : index
    %c0_23 = arith.constant 0 : index
    %c0_24 = arith.constant 0 : index
    %39 = vector.load %arg4[%c1, %c0_23, %c0_24] : memref<3x2x128xf32, #tpu.memory_space<vmem>>, vector<1x2x128xf32>
    %40 = vector.shape_cast %39 : vector<1x2x128xf32> to vector<2x128xf32>
    %c1_25 = arith.constant 1 : index
    %c0_26 = arith.constant 0 : index
    %c0_27 = arith.constant 0 : index
    %41 = vector.load %arg5[%c1_25, %c0_26, %c0_27] : memref<3x1x128xf32, #tpu.memory_space<vmem>>, vector<1x1x128xf32>
    %42 = vector.shape_cast %41 : vector<1x1x128xf32> to vector<1x128xf32>
    %c1_28 = arith.constant 1 : index
    %c0_29 = arith.constant 0 : index
    %c0_30 = arith.constant 0 : index
    %43 = vector.load %arg6[%c1_28, %c0_29, %c0_30] : memref<3x128x128xf32, #tpu.memory_space<vmem>>, vector<1x128x128xf32>
    %44 = vector.shape_cast %43 : vector<1x128x128xf32> to vector<128x128xf32>
    %c1_31 = arith.constant 1 : index
    %c0_32 = arith.constant 0 : index
    %c0_33 = arith.constant 0 : index
    %45 = vector.load %arg7[%c1_31, %c0_32, %c0_33] : memref<3x1x128xf32, #tpu.memory_space<vmem>>, vector<1x1x128xf32>
    %46 = vector.shape_cast %45 : vector<1x1x128xf32> to vector<1x128xf32>
    %47 = vector.extract_strided_slice %40 {offsets = [0, 0], sizes = [1, 128], strides = [1, 1]} : vector<2x128xf32> to vector<1x128xf32>
    %48 = vector.broadcast %6 : vector<32x1xf32> to vector<32x128xf32>
    %49 = vector.broadcast %47 : vector<1x128xf32> to vector<32x128xf32>
    %50 = arith.mulf %48, %49 : vector<32x128xf32>
    %51 = vector.extract_strided_slice %40 {offsets = [1, 0], sizes = [1, 128], strides = [1, 1]} : vector<2x128xf32> to vector<1x128xf32>
    %52 = vector.broadcast %7 : vector<32x1xf32> to vector<32x128xf32>
    %53 = vector.broadcast %51 : vector<1x128xf32> to vector<32x128xf32>
    %54 = arith.mulf %52, %53 : vector<32x128xf32>
    %55 = arith.addf %50, %54 : vector<32x128xf32>
    %56 = vector.broadcast %42 : vector<1x128xf32> to vector<32x128xf32>
    %57 = arith.addf %55, %56 : vector<32x128xf32>
    %cst_34 = arith.constant dense<0.000000e+00> : vector<32x128xf32>
    %58 = tpu.matmul %2, %38, %cst_34 {dimension_numbers = #tpu.dot_dimension_numbers<[1], [0], [0], [1], [0, 0, 1, 1], [], []>} : vector<32x16xf32>, vector<16x128xf32>, vector<32x128xf32> -> vector<32x128xf32>
    %59 = arith.addf %58, %57 : vector<32x128xf32>
    %cst_35 = arith.constant 0.000000e+00 : f32
    %60 = vector.broadcast %cst_35 : f32 to vector<32x128xf32>
    %61 = arith.maximumf %59, %60 : vector<32x128xf32>
    %cst_36 = arith.constant dense<0.000000e+00> : vector<16x128xf32>
    %62 = tpu.matmul %4, %61, %cst_36 {dimension_numbers = #tpu.dot_dimension_numbers<[1], [0], [0], [1], [0, 0, 1, 1], [], []>} : vector<16x32xf32>, vector<32x128xf32>, vector<16x128xf32> -> vector<16x128xf32>
    %63 = arith.addf %38, %62 : vector<16x128xf32>
    %cst_37 = arith.constant dense<0.000000e+00> : vector<16x128xf32>
    %64 = tpu.matmul %63, %44, %cst_37 {dimension_numbers = #tpu.dot_dimension_numbers<[1], [0], [0], [1], [0, 0, 1, 1], [], []>} : vector<16x128xf32>, vector<128x128xf32>, vector<16x128xf32> -> vector<16x128xf32>
    %65 = vector.broadcast %46 : vector<1x128xf32> to vector<16x128xf32>
    %66 = arith.addf %64, %65 : vector<16x128xf32>
    %cst_38 = arith.constant 0.00999999977 : f32
    %67 = vector.broadcast %cst_38 : f32 to vector<16x128xf32>
    %68 = arith.mulf %67, %66 : vector<16x128xf32>
    %69 = arith.maximumf %66, %68 : vector<16x128xf32>
    %c2 = arith.constant 2 : index
    %c0_39 = arith.constant 0 : index
    %c0_40 = arith.constant 0 : index
    %70 = vector.load %arg4[%c2, %c0_39, %c0_40] : memref<3x2x128xf32, #tpu.memory_space<vmem>>, vector<1x2x128xf32>
    %71 = vector.shape_cast %70 : vector<1x2x128xf32> to vector<2x128xf32>
    %c2_41 = arith.constant 2 : index
    %c0_42 = arith.constant 0 : index
    %c0_43 = arith.constant 0 : index
    %72 = vector.load %arg5[%c2_41, %c0_42, %c0_43] : memref<3x1x128xf32, #tpu.memory_space<vmem>>, vector<1x1x128xf32>
    %73 = vector.shape_cast %72 : vector<1x1x128xf32> to vector<1x128xf32>
    %c2_44 = arith.constant 2 : index
    %c0_45 = arith.constant 0 : index
    %c0_46 = arith.constant 0 : index
    %74 = vector.load %arg6[%c2_44, %c0_45, %c0_46] : memref<3x128x128xf32, #tpu.memory_space<vmem>>, vector<1x128x128xf32>
    %75 = vector.shape_cast %74 : vector<1x128x128xf32> to vector<128x128xf32>
    %c2_47 = arith.constant 2 : index
    %c0_48 = arith.constant 0 : index
    %c0_49 = arith.constant 0 : index
    %76 = vector.load %arg7[%c2_47, %c0_48, %c0_49] : memref<3x1x128xf32, #tpu.memory_space<vmem>>, vector<1x1x128xf32>
    %77 = vector.shape_cast %76 : vector<1x1x128xf32> to vector<1x128xf32>
    %78 = vector.extract_strided_slice %71 {offsets = [0, 0], sizes = [1, 128], strides = [1, 1]} : vector<2x128xf32> to vector<1x128xf32>
    %79 = vector.broadcast %6 : vector<32x1xf32> to vector<32x128xf32>
    %80 = vector.broadcast %78 : vector<1x128xf32> to vector<32x128xf32>
    %81 = arith.mulf %79, %80 : vector<32x128xf32>
    %82 = vector.extract_strided_slice %71 {offsets = [1, 0], sizes = [1, 128], strides = [1, 1]} : vector<2x128xf32> to vector<1x128xf32>
    %83 = vector.broadcast %7 : vector<32x1xf32> to vector<32x128xf32>
    %84 = vector.broadcast %82 : vector<1x128xf32> to vector<32x128xf32>
    %85 = arith.mulf %83, %84 : vector<32x128xf32>
    %86 = arith.addf %81, %85 : vector<32x128xf32>
    %87 = vector.broadcast %73 : vector<1x128xf32> to vector<32x128xf32>
    %88 = arith.addf %86, %87 : vector<32x128xf32>
    %cst_50 = arith.constant dense<0.000000e+00> : vector<32x128xf32>
    %89 = tpu.matmul %2, %69, %cst_50 {dimension_numbers = #tpu.dot_dimension_numbers<[1], [0], [0], [1], [0, 0, 1, 1], [], []>} : vector<32x16xf32>, vector<16x128xf32>, vector<32x128xf32> -> vector<32x128xf32>
    %90 = arith.addf %89, %88 : vector<32x128xf32>
    %cst_51 = arith.constant 0.000000e+00 : f32
    %91 = vector.broadcast %cst_51 : f32 to vector<32x128xf32>
    %92 = arith.maximumf %90, %91 : vector<32x128xf32>
    %cst_52 = arith.constant dense<0.000000e+00> : vector<16x128xf32>
    %93 = tpu.matmul %4, %92, %cst_52 {dimension_numbers = #tpu.dot_dimension_numbers<[1], [0], [0], [1], [0, 0, 1, 1], [], []>} : vector<16x32xf32>, vector<32x128xf32>, vector<16x128xf32> -> vector<16x128xf32>
    %94 = arith.addf %69, %93 : vector<16x128xf32>
    %cst_53 = arith.constant dense<0.000000e+00> : vector<16x128xf32>
    %95 = tpu.matmul %94, %75, %cst_53 {dimension_numbers = #tpu.dot_dimension_numbers<[1], [0], [0], [1], [0, 0, 1, 1], [], []>} : vector<16x128xf32>, vector<128x128xf32>, vector<16x128xf32> -> vector<16x128xf32>
    %96 = vector.broadcast %77 : vector<1x128xf32> to vector<16x128xf32>
    %97 = arith.addf %95, %96 : vector<16x128xf32>
    %cst_54 = arith.constant 0.00999999977 : f32
    %98 = vector.broadcast %cst_54 : f32 to vector<16x128xf32>
    %99 = arith.mulf %98, %97 : vector<16x128xf32>
    %100 = arith.maximumf %97, %99 : vector<16x128xf32>
    %c0_55 = arith.constant 0 : index
    %c0_56 = arith.constant 0 : index
    %101 = vector.load %arg8[%c0_55, %c0_56] : memref<16x128xf32, #tpu.memory_space<vmem>>, vector<16x128xf32>
    tpu.vector_store %arg8[%c0_55, %c0_56], %100 {strides = array<i32>} : memref<16x128xf32, #tpu.memory_space<vmem>>, vector<16x128xf32>,
    return
  }
}

</mosaic_0001>

<bundles_post_ra>
// kernel: tpu_custom_call.1
= control target key start
LH: loop header
LB: loop body
LE: loop exit
PB: predicated region body
PF: predicated region fallthrough
CT: control target
= control target key end

     0   :  { %13 = vsyncpa [#allocation3], 0  ;;  %s1772_s0 = inlined_call_operand.vmem [shape: f32[16,128], index: 0, kind: input, shape index: {}]   ;;  %s1773_s1 = inlined_call_operand.vmem [shape: bf16[32,16], index: 1, kind: input, shape index: {}]   ;;  %s1774_s2 = inlined_call_operand.vmem [shape: bf16[16,32], index: 2, kind: input, shape index: {}]   ;;  %s1775_s3 = inlined_call_operand.vmem [shape: f32[32,2], index: 3, kind: input, shape index: {}]   ;;  %s1776_s4 = inlined_call_operand.vmem [shape: f32[3,2,128], index: 4, kind: input, shape index: {}]   ;;  %s1777_s5 = inlined_call_operand.vmem [shape: f32[3,1,128], index: 5, kind: input, shape index: {}]   ;;  %s1778_s6 = inlined_call_operand.hbm [shape: f32[3,128,128], index: 6, kind: input, shape index: {}]   ;;  %s1779_s7 = inlined_call_operand.vmem [shape: f32[3,1,128], index: 7, kind: input, shape index: {}]   ;;  %s1780_s8 = inlined_call_operand.hbm [shape: f32[16,128], index: 8, kind: output, shape index: {}]  }
   0x1   :  { %14 = vsyncpa [#allocation4], 0  ;;  %s1537_s27 = smov [#allocation2]   ;;  %s1489_s9 = scalar_lea.hbm %s1778_s6, 6144 }
   0x2   :  { %s32_s28 = sshll.u32 %s1537_s27, 4  ;;  %p1490_p0 = scmp.ne.s32.totalorder %s1778_s6, %s1489_s9  ;;  %s33_s28 = int_to_ptr.vmem [resolvable:$true] %s32_s28 }
   0x3   :  { %p1493_p1 = scmp.lt.u32.totalorder %s1489_s9, %s1778_s6 }
   0x5   :  { %p1495_p2 = pnand %p1493_p1, %p1490_p0 }
   0x7   :  { %1498 = shalt.err (!%p1495_p2)
}
   0x8   :  { %s1499_s14 = scalar_lea.vmem %s33_s28, 6144  ;;  %p1504_p4 = scmp.lt.s32.totalorder %s33_s28, %s33_s28 }
   0x9   :  { %p1500_p3 = scmp.ne.s32.totalorder %s33_s28, %s1499_s14  ;;  %p1505_p5 = scmp.lt.s32.totalorder %s1499_s14, %s1499_s14 }
   0xb   :  { %p1506_p6 = por %p1505_p5, %p1504_p4 }
   0xd   :  { %p1507_p7 = pnand %p1506_p6, %p1500_p3 }
   0xf   :  { %1510 = shalt.err (!%p1507_p7)
}
  0x10   :  { %s1538_s15 = smov 128   ;;  %s1539_s16 = smov 8  }
  0x11   :  { %38 = dma.hbm_to_vmem [thread:$0]  %s1778_s6, 6144, %s33_s28, [#allocation3], %s1538_s15, %s1538_s15, %s1539_s16  }
  0x12   :  { %1533 = dma.done.wait [#allocation3], 6144  }
  0x13   :  { %1534 = vsyncadd [#allocation3], 4294961152  ;;  %v1540_v0 = vmov 0   ;;  %v1541_v1 = vmov 1   ;;  %v1606_v2 = vld [vmem:[%s1772_s0] sm:$0xff]  ;;  %v1611_v3 = vld [vmem:[%s1772_s0 + $0x8] sm:$0xff]  ;;  %v101_v28 = vlaneseq }
  0x14   :  { %1484 = vset.pattern.permute.xlu0 %v1540_v0  ;;  %1485 = vset.pattern.permute.xlu1 %v1541_v1  ;;  %v1076_v4 = vld [vmem:[%s1773_s1] sm:$0xff]   ;;  %vm147_vm0 = vcmask 130048   ;;  %v1346_v5 = vpack.c.bf16 %v1611_v3, %v1606_v2  ;;  %v1087_v7 = vld [vmem:[%s1773_s1 + $0x8] sm:$0xff]   ;;  %v60_v13 = vld [vmem:[%s1775_s3 + $0x10] sm:$0xff]  ;;  %vm249_vm1 = vcmask 261120   ;;  %s1542_s27 = smov [#allocation5]  }
  0x15   :  { %v1618_v6 = vunpack.c.l.bf16 %v1076_v4  ;;  %v58_v8 = vld [vmem:[%s1775_s3] sm:$0xff]  ;;  %v1626_v9 = vunpack.c.h.bf16 %v1076_v4  ;;  %v59_v10 = vld [vmem:[%s1775_s3 + $0x8] sm:$0xff]  ;;  %v1633_v11 = vunpack.c.l.bf16 %v1087_v7  ;;  %v1637_v12 = vunpack.c.h.bf16 %v1087_v7  ;;  %v61_v14 = vld [vmem:[%s1775_s3 + $0x18] sm:$0xff]  ;;  %s1033_s0 = sshll.u32 %s1542_s27, 4  ;;  %s1034_s0 = int_to_ptr.vmem [resolvable:$true] %s1033_s0 }
  0x16   :  { %83 = vperm.xlu0 %1484, %v58_v8   ;;  %110 = vperm.xlu1 %1485, %v58_v8   ;;  %v1652_v15 = vld [vmem:[%s1774_s2] sm:$0xff]   ;;  %v65_v18 = vld [vmem:[#allocation2 + $0x8] sm:$0xff]  ;;  %v66_v19 = vld [vmem:[#allocation2 + $0x10] sm:$0xff]  ;;  %v102_v32 = vshrl.u32 %v101_v28, 7  ;;  %s1511_s28 = scalar_lea.vmem %s1034_s0, 256  ;;  %p1516_p9 = scmp.lt.s32.totalorder %s1034_s0, %s1034_s0 }
  0x17   :  { %1347 = vmatprep.subr.bf16.mxu1 %v1346_v5  ;;  %1182 = vmatprep.mubr.msk.f32.mxu1 %vm147_vm0, %v1618_v6  ;;  %v1655_v16 = vunpack.c.l.bf16 %v1652_v15  ;;  %v64_v17 = vld [vmem:[#allocation2] sm:$0xff]  ;;  %v67_v21 = vld [vmem:[#allocation2 + $0x18] sm:$0xff]  ;;  %v69_v24 = vld [vmem:[#allocation2 + $0x28] sm:$0xff]  ;;  %p1512_p8 = scmp.ne.s32.totalorder %s1034_s0, %s1511_s28  ;;  %p1517_p10 = scmp.lt.s32.totalorder %s1511_s28, %s1511_s28 }
  0x18   :  { %1349 = vmatpush3.bf16.msra.mxu1 %v1346_v5  ;;  %v1358_v20 = vpack.c.bf16 %v65_v18, %v64_v17  ;;  %v1362_v22 = vpack.c.bf16 %v67_v21, %v66_v19  ;;  %v68_v23 = vld [vmem:[#allocation2 + $0x20] sm:$0xff]  ;;  %v70_v26 = vld [vmem:[#allocation2 + $0x30] sm:$0xff]  ;;  %v71_v27 = vld [vmem:[#allocation2 + $0x38] sm:$0xff]  ;;  %v103_v36 = vsub.s32 0, %v102_v32  ;;  %v127_v39 = vsub.s32 1, %v102_v32 }
  0x19   :  { %v1366_v25 = vpack.c.bf16 %v69_v24, %v68_v23  ;;  %v1370_v29 = vpack.c.bf16 %v71_v27, %v70_v26  ;;  %v72_v30 = vld [vmem:[#allocation2 + $0x40] sm:$0xff]  ;;  %v73_v31 = vld [vmem:[#allocation2 + $0x48] sm:$0xff]  ;;  %v74_v34 = vld [vmem:[#allocation2 + $0x50] sm:$0xff]  ;;  %p1518_p11 = por %p1517_p10, %p1516_p9 }
  0x1a   :  { %88 = vperm.xlu0 %1484, %v59_v10   ;;  %114 = vperm.xlu1 %1485, %v59_v10   ;;  %v1374_v33 = vpack.c.bf16 %v73_v31, %v72_v30  ;;  %v75_v35 = vld [vmem:[#allocation2 + $0x58] sm:$0xff]  ;;  %v1053_v37 = vld [vmem:[%s1776_s4 + $0x2] sm:$0x3]  ;;  %v1064_v38 = vld [vmem:[%s1776_s4 + $0x4] sm:$0x3] }
  0x1b   :  { %1183 = vmatmul.mubr.msk.f32.vlgmr.msra.gmra.mrb[0].mxu1 %vm147_vm0, %v1626_v9  ;;  %1359 = vmatprep.subr.bf16.mxu0 %v1358_v20  ;;  %v1378_v40 = vpack.c.bf16 %v75_v35, %v74_v34  ;;  %v76_v41 = vld [vmem:[#allocation2 + $0x60] sm:$0xff]  ;;  %v77_v42 = vld [vmem:[#allocation2 + $0x68] sm:$0xff]  ;;  %v444_v43 = vrot.slane %v1053_v37, %v103_v36  ;;  %v748_v44 = vrot.slane %v1064_v38, %v103_v36  ;;  %p1519_p12 = pnand %p1518_p11, %p1512_p8 }
  0x1c   :  { %1185 = vmatprep.mubr.msk.f32.mxu1 %vm147_vm0, %v1633_v11  ;;  %1361 = vmatpush3.bf16.msra.mxu0 %v1358_v20  ;;  %v452_v45 = vrot.slane %v1053_v37, %v127_v39  ;;  %v756_v46 = vrot.slane %v1064_v38, %v127_v39  ;;  %v1382_v47 = vpack.c.bf16 %v77_v42, %v76_v41  ;;  %v62_v24 = vld [vmem:[%s1776_s4] sm:$0x3] }
  0x1d   :  { %1363 = vmatprep.subr.bf16.mxu0 %v1362_v22  ;;  %v128_v26 = vrot.slane %v62_v24, %v127_v39  ;;  %v1045_v37 = vld [vmem:[%s1777_s5] ss:$0 sm:$0xff] }
  0x1e   :  { %93 = vperm.xlu0 %1484, %v60_v13   ;;  %1486 = vset.pattern.permute.xlu1 %v1540_v0 }
  0x1f   :  { %1186 = vmatmul.mubr.msk.f32.gmra.mrb[2].mxu1 %vm147_vm0, %v1637_v12  ;;  %98 = vperm.xlu1 %1486, %v61_v14  }
  0x20   :  { %1196 = vmatprep.mubr.msk.f32.mxu1 %vm249_vm1, %v1655_v16  ;;  %1365 = vmatpush3.bf16.msra.mxu0 %v1362_v22 }
  0x21   :  { %1367 = vmatprep.subr.bf16.mxu0 %v1366_v25 }
  0x22   :  { %1487 = vset.pattern.permute.xlu0 %v1541_v1 }
  0x23   :  { %118 = vperm.xlu0 %1487, %v60_v13   ;;  %1488 = vset.pattern.permute.xlu1 %v1541_v1 }
  0x24   :  { %122 = vperm.xlu1 %1488, %v61_v14   ;;  %1369 = vmatpush3.bf16.msra.mxu0 %v1366_v25  ;;  %v104_v25 = vrot.slane %v62_v24, %v103_v36 }
  0x25   :  { %1371 = vmatprep.subr.bf16.mxu0 %v1370_v29 }
  0x28   :  { %1373 = vmatpush3.bf16.msra.mxu0 %v1370_v29 }
  0x29   :  { %1375 = vmatprep.subr.bf16.mxu0 %v1374_v33 }
  0x2c   :  { %1377 = vmatpush3.bf16.msra.mxu0 %v1374_v33 }
  0x2d   :  { %1379 = vmatprep.subr.bf16.mxu0 %v1378_v40 }
  0x30   :  { %1381 = vmatpush3.bf16.msra.mxu0 %v1378_v40 }
  0x31   :  { %1383 = vmatprep.subr.bf16.mxu0 %v1382_v47 }
  0x34   :  { %1385 = vmatpush3.bf16.msra.mxu0 %v1382_v47 }
  0x95   :  { %v84_v48 = vpop.permute.xlu0 %83  ;;  %v111_v49 = vpop.permute.xlu1 %110 }
  0x96   :  { %v445_v50 = vmul.f32 %v444_v43, %v84_v48  ;;  %v749_v51 = vmul.f32 %v748_v44, %v84_v48  ;;  %v453_v52 = vmul.f32 %v452_v45, %v111_v49  ;;  %v757_v53 = vmul.f32 %v756_v46, %v111_v49 }
  0x97   :  { %v105_v29 = vmul.f32 %v104_v25, %v84_v48  ;;  %v129_v30 = vmul.f32 %v128_v26, %v111_v49 }
  0x98   :  { %v1665_v56 = vadd.f32 %v453_v52, %v445_v50  ;;  %v1667_v57 = vadd.f32 %v757_v53, %v749_v51 }
  0x99   :  { %v89_v54 = vpop.permute.xlu0 %88  ;;  %v115_v55 = vpop.permute.xlu1 %114  ;;  %v133_v38 = vadd.f32 %v129_v30, %v105_v29 }
  0x9a   :  { %v446_v58 = vmul.f32 %v444_v43, %v89_v54  ;;  %v750_v59 = vmul.f32 %v748_v44, %v89_v54  ;;  %v454_v60 = vmul.f32 %v452_v45, %v115_v55  ;;  %v758_v61 = vmul.f32 %v756_v46, %v115_v55 }
  0x9b   :  { %v106_v27 = vmul.f32 %v104_v25, %v89_v54  ;;  %v130_v28 = vmul.f32 %v128_v26, %v115_v55  ;;  %v143_v36 = vadd.f32 %v1045_v37, %v133_v38 }
  0x9c   :  { %v1669_v63 = vadd.f32 %v454_v60, %v446_v58  ;;  %v1671_v0 = vadd.f32 %v758_v61, %v750_v59  ;;  %v1688_v60 = vunpack.c.h.bf16 %v1652_v15  ;;  %v78_v61 = vld [vmem:[#allocation2 + $0x70] sm:$0xff]  ;;  %v1052_v15 = vld [vmem:[%s1779_s7] ss:$0 sm:$0xff] }
  0x9d   :  { %v94_v62 = vpop.permute.xlu0 %93  ;;  %v134_v33 = vadd.f32 %v130_v28, %v106_v27 }
  0x9e   :  { %v447_v1 = vmul.f32 %v444_v43, %v94_v62  ;;  %v751_v4 = vmul.f32 %v748_v44, %v94_v62  ;;  %v99_v5 = vpop.permute.xlu1 %98  ;;  %v107_v34 = vmul.f32 %v104_v25, %v94_v62  ;;  %v79_v62 = vld [vmem:[#allocation2 + $0x78] sm:$0xff] }
  0x9f   :  { %v448_v7 = vmul.f32 %v444_v43, %v99_v5  ;;  %v752_v8 = vmul.f32 %v748_v44, %v99_v5  ;;  %v108_v31 = vmul.f32 %v104_v25, %v99_v5  ;;  %v144_v41 = vadd.f32 %v1045_v37, %v134_v33 }
  0xa2   :  { %v119_v10 = vpop.permute.xlu0 %118 }
  0xa3   :  { %v455_v13 = vmul.f32 %v452_v45, %v119_v10  ;;  %v759_v14 = vmul.f32 %v756_v46, %v119_v10  ;;  %v123_v17 = vpop.permute.xlu1 %122  ;;  %v131_v35 = vmul.f32 %v128_v26, %v119_v10 }
  0xa4   :  { %v456_v18 = vmul.f32 %v452_v45, %v123_v17  ;;  %v760_v19 = vmul.f32 %v756_v46, %v123_v17  ;;  %v132_v32 = vmul.f32 %v128_v26, %v123_v17 }
  0xa5   :  { %v1673_v20 = vadd.f32 %v455_v13, %v447_v1  ;;  %v1675_v21 = vadd.f32 %v759_v14, %v751_v4  ;;  %v135_v42 = vadd.f32 %v131_v35, %v107_v34  ;;  %v1386_v1 = vpack.c.bf16 %v79_v62, %v78_v61  ;;  %v436_v61 = vld [vmem:[#allocation2 + $0xe8] sm:$0xff] }
  0xa6   :  { %v1677_v22 = vadd.f32 %v456_v18, %v448_v7  ;;  %v1679_v23 = vadd.f32 %v760_v19, %v752_v8  ;;  %v136_v40 = vadd.f32 %v132_v32, %v108_v31 }
  0xa7   :  { %v145_v50 = vadd.f32 %v1045_v37, %v135_v42  ;;  %1387 = vmatprep.subr.bf16.mxu0 %v1386_v1 }
  0xa8   :  { %v146_v47 = vadd.f32 %v1045_v37, %v136_v40  ;;  %1389 = vmatpush3.bf16.msra.mxu0 %v1386_v1  ;;  %v437_v1 = vld [vmem:[#allocation2 + $0xf0] sm:$0xff] }
  0xee   :  { %v1184_v43 = vpop.f32.mrb[0].mxu1 }
  0xef   :  { %v232_v39 = vadd.f32 %v1184_v43, %v144_v41  ;;  %v226_v44 = vpop.f32.mrb[1].mxu1  ;;  %v423_v43 = vld [vmem:[#allocation2 + $0x80] sm:$0xff] }
  0xf0   :  { %v227_v45 = vadd.f32 %v226_v44, %v143_v36  ;;  %v425_v44 = vld [vmem:[#allocation2 + $0x90] sm:$0xff] }
  0xf1   :  { %v246_v46 = vmax.f32 %v232_v39, 0.0 }
  0xf2   :  { %v245_v48 = vmax.f32 %v227_v45, 0.0  ;;  %v1187_v49 = vpop.f32.mrb[2].mxu1  ;;  %v426_v45 = vld [vmem:[#allocation2 + $0x98] sm:$0xff] }
  0xf3   :  { %v242_v51 = vadd.f32 %v1187_v49, %v146_v47  ;;  %v236_v52 = vpop.f32.mrb[3].mxu1  ;;  %v430_v49 = vld [vmem:[#allocation2 + $0xb8] sm:$0xff] }
  0xf4   :  { %v1350_v53 = vpack.c.bf16 %v246_v46, %v245_v48  ;;  %v237_v54 = vadd.f32 %v236_v52, %v145_v50  ;;  %v427_v46 = vld [vmem:[#allocation2 + $0xa0] sm:$0xff]  ;;  %v429_v48 = vld [vmem:[#allocation2 + $0xb0] sm:$0xff]  ;;  %v432_v52 = vld [vmem:[#allocation2 + $0xc8] sm:$0xff] }
  0xf5   :  { %v248_v55 = vmax.f32 %v242_v51, 0.0  ;;  %v1414_v50 = vpack.c.bf16 %v430_v49, %v429_v48  ;;  %v431_v51 = vld [vmem:[#allocation2 + $0xc0] sm:$0xff] }
  0xf6   :  { %v247_v58 = vmax.f32 %v237_v54, 0.0  ;;  %1351 = vmatprep.subr.bf16.mxu1 %v1350_v53  ;;  %v433_v54 = vld [vmem:[#allocation2 + $0xd0] sm:$0xff] }
  0xf7   :  { %1353 = vmatpush3.bf16.msra.mxu1 %v1350_v53  ;;  %v1418_v53 = vpack.c.bf16 %v432_v52, %v431_v51 }
  0xf8   :  { %v1354_v59 = vpack.c.bf16 %v248_v55, %v247_v58  ;;  %v434_v55 = vld [vmem:[#allocation2 + $0xd8] sm:$0xff] }
  0xf9   :  { %v1422_v58 = vpack.c.bf16 %v434_v55, %v433_v54 }
  0xfa   :  { %1355 = vmatprep.subr.bf16.mxu1 %v1354_v59 }
  0xfb   :  { %1357 = vmatpush3.bf16.msra.mxu1 %v1354_v59  ;;  %v435_v59 = vld [vmem:[#allocation2 + $0xe0] sm:$0xff] }
  0xfc   :  { %v1426_v62 = vpack.c.bf16 %v436_v61, %v435_v59 }
  0xfe   :  { %1197 = vmatmul.mubr.msk.f32.vlgmr.msra.gmra.mrb[4].mxu1 %vm249_vm1, %v1688_v60 }
  0xff   :  { %1238 = vmatprep.mubr.msk.f32.mxu1 %vm147_vm0, %v1618_v6 }
 0x1d1   :  { %v1198_v4 = vpop.f32.mrb[4].mxu1 }
 0x1d2   :  { %v322_v5 = vpop.f32.mrb[5].mxu1  ;;  %v332_v8 = vadd.f32 %v1198_v4, %v1611_v3  ;;  %v438_v4 = vld [vmem:[#allocation2 + $0xf8] sm:$0xff] }
 0x1d3   :  { %v331_v7 = vadd.f32 %v322_v5, %v1606_v2  ;;  %v1430_v5 = vpack.c.bf16 %v438_v4, %v437_v1  ;;  %v1074_v4 = vld [vmem:[%s1779_s7 + $0x2] ss:$0 sm:$0xff] }
 0x1d5   :  { %1231 = vmatprep.mubr.f32.mxu0 %v331_v7 }
 0x1d6   :  { %1232 = vmatmul.mubr.f32.vlgmr.msra.gmra.mrb[0].mxu0 %v332_v8 }
 0x1d7   :  { %1294 = vmatprep.mubr.msk.f32.mxu0 %vm147_vm0, %v1618_v6  ;;  %v1056_v6 = vld [vmem:[%s1777_s5 + $0x1] ss:$0 sm:$0xff] }
 0x1d8   :  { %v468_v25 = vadd.f32 %v1056_v6, %v1669_v63  ;;  %v467_v27 = vadd.f32 %v1056_v6, %v1665_v56  ;;  %v470_v32 = vadd.f32 %v1056_v6, %v1677_v22  ;;  %v469_v35 = vadd.f32 %v1056_v6, %v1673_v20  ;;  %v424_v63 = vld [vmem:[#allocation2 + $0x88] sm:$0xff] }
 0x1d9   :  { %v1402_v39 = vpack.c.bf16 %v424_v63, %v423_v43  ;;  %v1406_v22 = vpack.c.bf16 %v426_v45, %v425_v44  ;;  %v428_v20 = vld [vmem:[#allocation2 + $0xa8] sm:$0xff] }
 0x1da   :  { %v1410_v47 = vpack.c.bf16 %v428_v20, %v427_v46  ;;  %v740_v43 = vld [vmem:[#allocation2 + $0x168] sm:$0xff] }
 0x2a9   :  { %v1233_v10 = vpop.f32.mrb[0].mxu0 }
 0x2aa   :  { %v411_v13 = vadd.f32 %v1233_v10, %v1052_v15  ;;  %v405_v14 = vpop.f32.mrb[1].mxu0 }
 0x2ab   :  { %v406_v17 = vadd.f32 %v1052_v15, %v405_v14 }
 0x2ac   :  { %v415_v18 = vmul.f32 0.01, %v411_v13 }
 0x2ad   :  { %v414_v19 = vmul.f32 0.01, %v406_v17 }
 0x2ae   :  { %v1701_v24 = vmax.f32 %v411_v13, %v415_v18  ;;  %v1063_v13 = vld [vmem:[%s1779_s7 + $0x1] ss:$0 sm:$0xff] }
 0x2af   :  { %v1703_v2 = vmax.f32 %v406_v17, %v414_v19 }
 0x2b1   :  { %v1390_v3 = vpack.c.bf16 %v1701_v24, %v1703_v2 }
 0x2b3   :  { %1391 = vmatprep.subr.bf16.mxu1 %v1390_v3 }
 0x2b4   :  { %1393 = vmatpush3.bf16.msra.mxu1 %v1390_v3 }
 0x2b7   :  { %1239 = vmatmul.mubr.msk.f32.vlgmr.msra.gmra.mrb[6].mxu1 %vm147_vm0, %v1626_v9 }
 0x2b8   :  { %1241 = vmatprep.mubr.msk.f32.mxu1 %vm147_vm0, %v1633_v11 }
 0x2bb   :  { %1242 = vmatmul.mubr.msk.f32.gmra.mrb[8].mxu1 %vm147_vm0, %v1637_v12 }
 0x2bc   :  { %1252 = vmatprep.mubr.msk.f32.mxu1 %vm249_vm1, %v1655_v16 }
 0x38a   :  { %v1240_v26 = vpop.f32.mrb[6].mxu1 }
 0x38b   :  { %v543_v28 = vadd.f32 %v1240_v26, %v468_v25  ;;  %v537_v29 = vpop.f32.mrb[7].mxu1  ;;  %v728_v26 = vld [vmem:[#allocation2 + $0x108] sm:$0xff] }
 0x38c   :  { %v538_v30 = vadd.f32 %v537_v29, %v467_v27  ;;  %v729_v27 = vld [vmem:[#allocation2 + $0x110] sm:$0xff]  ;;  %v730_v29 = vld [vmem:[#allocation2 + $0x118] sm:$0xff] }
 0x38d   :  { %v557_v31 = vmax.f32 %v543_v28, 0.0 }
 0x38e   :  { %v556_v33 = vmax.f32 %v538_v30, 0.0  ;;  %v1243_v34 = vpop.f32.mrb[8].mxu1  ;;  %v1450_v30 = vpack.c.bf16 %v730_v29, %v729_v27 }
 0x38f   :  { %v553_v37 = vadd.f32 %v1243_v34, %v470_v32  ;;  %v547_v38 = vpop.f32.mrb[9].mxu1  ;;  %v732_v32 = vld [vmem:[#allocation2 + $0x128] sm:$0xff]  ;;  %v733_v34 = vld [vmem:[#allocation2 + $0x130] sm:$0xff] }
 0x390   :  { %v1394_v40 = vpack.c.bf16 %v557_v31, %v556_v33  ;;  %v548_v41 = vadd.f32 %v547_v38, %v469_v35  ;;  %v731_v31 = vld [vmem:[#allocation2 + $0x120] sm:$0xff]  ;;  %v737_v38 = vld [vmem:[#allocation2 + $0x150] sm:$0xff] }
 0x391   :  { %v559_v42 = vmax.f32 %v553_v37, 0.0  ;;  %v1454_v33 = vpack.c.bf16 %v732_v32, %v731_v31  ;;  %v735_v35 = vld [vmem:[#allocation2 + $0x140] sm:$0xff]  ;;  %v736_v37 = vld [vmem:[#allocation2 + $0x148] sm:$0xff] }
 0x392   :  { %v558_v36 = vmax.f32 %v548_v41, 0.0  ;;  %1395 = vmatprep.subr.bf16.mxu1 %v1394_v40 }
 0x393   :  { %1397 = vmatpush3.bf16.msra.mxu1 %v1394_v40  ;;  %v738_v40 = vld [vmem:[#allocation2 + $0x158] sm:$0xff] }
 0x394   :  { %v1398_v56 = vpack.c.bf16 %v559_v42, %v558_v36  ;;  %v1466_v41 = vpack.c.bf16 %v738_v40, %v737_v38  ;;  %v739_v42 = vld [vmem:[#allocation2 + $0x160] sm:$0xff] }
 0x395   :  { %v1470_v63 = vpack.c.bf16 %v740_v43, %v739_v42  ;;  %v1067_v36 = vld [vmem:[%s1777_s5 + $0x2] ss:$0 sm:$0xff] }
 0x396   :  { %1399 = vmatprep.subr.bf16.mxu1 %v1398_v56  ;;  %v771_v44 = vadd.f32 %v1067_v36, %v1667_v57  ;;  %v741_v57 = vld [vmem:[#allocation2 + $0x170] sm:$0xff] }
 0x397   :  { %1401 = vmatpush3.bf16.msra.mxu1 %v1398_v56  ;;  %v772_v56 = vadd.f32 %v1067_v36, %v1671_v0 }
 0x398   :  { %1403 = vmatprep.subr.bf16.mxu1 %v1402_v39 }
 0x39a   :  { %1253 = vmatmul.mubr.msk.f32.vlgmr.msra.gmra.mrb[10].mxu1 %vm249_vm1, %v1688_v60 }
 0x39b   :  { %1405 = vmatpush3.bf16.msra.mxu1 %v1402_v39 }
 0x39c   :  { %1407 = vmatprep.subr.bf16.mxu1 %v1406_v22 }
 0x39f   :  { %1409 = vmatpush3.bf16.msra.mxu1 %v1406_v22 }
 0x3a0   :  { %1411 = vmatprep.subr.bf16.mxu1 %v1410_v47 }
 0x3a3   :  { %1413 = vmatpush3.bf16.msra.mxu1 %v1410_v47  ;;  %v774_v47 = vadd.f32 %v1067_v36, %v1679_v23  ;;  %v742_v23 = vld [vmem:[#allocation2 + $0x178] sm:$0xff] }
 0x3a4   :  { %1415 = vmatprep.subr.bf16.mxu1 %v1414_v50  ;;  %v1474_v59 = vpack.c.bf16 %v742_v23, %v741_v57 }
 0x3a7   :  { %1417 = vmatpush3.bf16.msra.mxu1 %v1414_v50  ;;  %v773_v50 = vadd.f32 %v1067_v36, %v1675_v21 }
 0x3a8   :  { %1419 = vmatprep.subr.bf16.mxu1 %v1418_v53 }
 0x3ab   :  { %1421 = vmatpush3.bf16.msra.mxu1 %v1418_v53 }
 0x3ac   :  { %1423 = vmatprep.subr.bf16.mxu1 %v1422_v58 }
 0x3af   :  { %1425 = vmatpush3.bf16.msra.mxu1 %v1422_v58 }
 0x3b0   :  { %1427 = vmatprep.subr.bf16.mxu1 %v1426_v62 }
 0x3b3   :  { %1429 = vmatpush3.bf16.msra.mxu1 %v1426_v62 }
 0x3b4   :  { %1431 = vmatprep.subr.bf16.mxu1 %v1430_v5 }
 0x3b7   :  { %1433 = vmatpush3.bf16.msra.mxu1 %v1430_v5 }
 0x46d   :  { %v1254_v7 = vpop.f32.mrb[10].mxu1 }
 0x46e   :  { %v626_v8 = vpop.f32.mrb[11].mxu1  ;;  %v636_v10 = vadd.f32 %v1254_v7, %v1701_v24 }
 0x46f   :  { %v635_v15 = vadd.f32 %v626_v8, %v1703_v2 }
 0x471   :  { %1287 = vmatprep.mubr.f32.mxu1 %v635_v15 }
 0x472   :  { %1288 = vmatmul.mubr.f32.vlgmr.msra.gmra.mrb[12].mxu1 %v636_v10 }
 0x473   :  { %1308 = vmatprep.mubr.msk.f32.mxu1 %vm249_vm1, %v1655_v16  ;;  %v727_v16 = vld [vmem:[#allocation2 + $0x100] sm:$0xff] }
 0x474   :  { %v1446_v28 = vpack.c.bf16 %v728_v26, %v727_v16 }
 0x545   :  { %v1289_v14 = vpop.f32.mrb[12].mxu1 }
 0x546   :  { %v715_v17 = vadd.f32 %v1289_v14, %v1063_v13  ;;  %v709_v18 = vpop.f32.mrb[13].mxu1 }
 0x547   :  { %v710_v19 = vadd.f32 %v1063_v13, %v709_v18 }
 0x548   :  { %v719_v3 = vmul.f32 0.01, %v715_v17 }
 0x549   :  { %v718_v6 = vmul.f32 0.01, %v710_v19 }
 0x54a   :  { %v1731_v25 = vmax.f32 %v715_v17, %v719_v3 }
 0x54b   :  { %v1733_v2 = vmax.f32 %v710_v19, %v718_v6 }
 0x54d   :  { %v1434_v24 = vpack.c.bf16 %v1731_v25, %v1733_v2 }
 0x54f   :  { %1435 = vmatprep.subr.bf16.mxu0 %v1434_v24 }
 0x550   :  { %1437 = vmatpush3.bf16.msra.mxu0 %v1434_v24 }
 0x551   :  { %1447 = vmatprep.subr.bf16.mxu0 %v1446_v28 }
 0x553   :  { %1295 = vmatmul.mubr.msk.f32.vlgmr.msra.gmra.mrb[2].mxu0 %vm147_vm0, %v1626_v9  ;;  %v734_v9 = vld [vmem:[#allocation2 + $0x138] sm:$0xff] }
 0x554   :  { %1297 = vmatprep.mubr.msk.f32.mxu0 %vm147_vm0, %v1633_v11  ;;  %1449 = vmatpush3.bf16.msra.mxu0 %v1446_v28  ;;  %v1458_v11 = vpack.c.bf16 %v734_v9, %v733_v34 }
 0x555   :  { %1451 = vmatprep.subr.bf16.mxu0 %v1450_v30 }
 0x557   :  { %1298 = vmatmul.mubr.msk.f32.gmra.mrb[4].mxu0 %vm147_vm0, %v1637_v12  ;;  %v1462_v12 = vpack.c.bf16 %v736_v37, %v735_v35 }
 0x558   :  { %1453 = vmatpush3.bf16.msra.mxu0 %v1450_v30 }
 0x559   :  { %1455 = vmatprep.subr.bf16.mxu0 %v1454_v33 }
 0x55c   :  { %1457 = vmatpush3.bf16.msra.mxu0 %v1454_v33 }
 0x55d   :  { %1459 = vmatprep.subr.bf16.mxu0 %v1458_v11 }
 0x560   :  { %1461 = vmatpush3.bf16.msra.mxu0 %v1458_v11 }
 0x561   :  { %1463 = vmatprep.subr.bf16.mxu0 %v1462_v12 }
 0x564   :  { %1465 = vmatpush3.bf16.msra.mxu0 %v1462_v12 }
 0x565   :  { %1467 = vmatprep.subr.bf16.mxu0 %v1466_v41 }
 0x568   :  { %1469 = vmatpush3.bf16.msra.mxu0 %v1466_v41 }
 0x569   :  { %1471 = vmatprep.subr.bf16.mxu0 %v1470_v63 }
 0x56c   :  { %1473 = vmatpush3.bf16.msra.mxu0 %v1470_v63 }
 0x56d   :  { %1475 = vmatprep.subr.bf16.mxu0 %v1474_v59 }
 0x570   :  { %1477 = vmatpush3.bf16.msra.mxu0 %v1474_v59 }
 0x626   :  { %v1296_v39 = vpop.f32.mrb[2].mxu0 }
 0x627   :  { %v847_v45 = vadd.f32 %v1296_v39, %v772_v56  ;;  %v841_v22 = vpop.f32.mrb[3].mxu0 }
 0x628   :  { %v842_v46 = vadd.f32 %v841_v22, %v771_v44 }
 0x629   :  { %v861_v20 = vmax.f32 %v847_v45, 0.0 }
 0x62a   :  { %v860_v48 = vmax.f32 %v842_v46, 0.0  ;;  %v1299_v49 = vpop.f32.mrb[4].mxu0 }
 0x62b   :  { %v857_v51 = vadd.f32 %v1299_v49, %v774_v47  ;;  %v851_v52 = vpop.f32.mrb[5].mxu0 }
 0x62c   :  { %v1438_v53 = vpack.c.bf16 %v861_v20, %v860_v48  ;;  %v852_v54 = vadd.f32 %v851_v52, %v773_v50 }
 0x62d   :  { %v863_v55 = vmax.f32 %v857_v51, 0.0 }
 0x62e   :  { %v862_v58 = vmax.f32 %v852_v54, 0.0  ;;  %1439 = vmatprep.subr.bf16.mxu1 %v1438_v53 }
 0x62f   :  { %1441 = vmatpush3.bf16.msra.mxu1 %v1438_v53 }
 0x630   :  { %v1442_v0 = vpack.c.bf16 %v863_v55, %v862_v58 }
 0x632   :  { %1443 = vmatprep.subr.bf16.mxu1 %v1442_v0 }
 0x633   :  { %1445 = vmatpush3.bf16.msra.mxu1 %v1442_v0 }
 0x636   :  { %1309 = vmatmul.mubr.msk.f32.vlgmr.msra.gmra.mrb[14].mxu1 %vm249_vm1, %v1688_v60 }
 0x709   :  { %v1310_v21 = vpop.f32.mrb[14].mxu1 }
 0x70a   :  { %v930_v61 = vpop.f32.mrb[15].mxu1  ;;  %v940_v1 = vadd.f32 %v1310_v21, %v1731_v25 }
 0x70b   :  { %v939_v62 = vadd.f32 %v930_v61, %v1733_v2 }
 0x70d   :  { %1343 = vmatprep.mubr.f32.mxu0 %v939_v62 }
 0x70e   :  { %1344 = vmatmul.mubr.f32.vlgmr.msra.gmra.mrb[6].mxu0 %v940_v1 }
 0x7e1   :  { %v1345_v5 = vpop.f32.mrb[6].mxu0 }
 0x7e2   :  { %v1019_v7 = vadd.f32 %v1345_v5, %v1074_v4  ;;  %v1013_v60 = vpop.f32.mrb[7].mxu0 }
 0x7e3   :  { %v1014_v8 = vadd.f32 %v1074_v4, %v1013_v60 }
 0x7e4   :  { %v1023_v15 = vmul.f32 0.01, %v1019_v7 }
 0x7e5   :  { %v1022_v10 = vmul.f32 0.01, %v1014_v8 }
 0x7e6   :  { %v1025_v13 = vmax.f32 %v1019_v7, %v1023_v15 }
 0x7e7   :  { %v1024_v14 = vmax.f32 %v1014_v8, %v1022_v10 }
 0x7e8   :  { %1027 = vst [vmem:[#allocation5 + $0x8] sm:$0xff] %v1025_v13 }
 0x7e9   :  { %1026 = vst [vmem:[#allocation5] sm:$0xff] %v1024_v14 }
 0x7ea   :  { %1522 = shalt.err (!%p1519_p12)
}
 0x7eb   :  { %s1523_s29 = scalar_lea.hbm %s1780_s8, 256 }
 0x7ec   :  { %p1524_p13 = scmp.ne.s32.totalorder %s1780_s8, %s1523_s29  ;;  %p1527_p0 = scmp.lt.u32.totalorder %s1523_s29, %s1780_s8 }
 0x7ee   :  { %p1529_p1 = pnand %p1527_p0, %p1524_p13 }
 0x7f0   :  { %1532 = shalt.err (!%p1529_p1)
}
 0x7f1   :  { %1039 = dma.vmem_to_hbm [thread:$0]  %s1034_s0, 256, %s1780_s8, [#allocation4], %s1538_s15, %s1538_s15, %s1539_s16  }
 0x7f2   :  { %1535 = dma.done.wait [#allocation4], 256  }
 0x7f3   :  { %1536 = vsyncadd [#allocation4], 4294967040 }
 0x7f4   :  { %1043 = vsyncpa [#allocation3], 1 }
 0x7f5   :  { %1044 = vsyncpa [#allocation4], 1 }

</bundles_post_ra>
